<compile_context>
chip_gen: v6e
topology: v6e:2x2x1
jax: 0.10.0
libtpu: 0.0.40
codegen_flags: <defaults>
</compile_context>

<pallas_src>
import functools

import jax
import jax.numpy as jnp
from jax import lax
from jax.experimental import pallas as pl
from jax.experimental.pallas import tpu as pltpu

_LANE = 128
_TR_MAX = 1024   # rows per grid block (f32 block = 512 KiB)
_NCORES_MAX = 2  # v7x has 2 TensorCores; extra axis is harmless on v5e/v6e


def _ganloss_kernel(x_ref, o_ref, acc_ref, *, is_real, rows, tr, spc,
                    total_steps, mask_tail, has_dup):
    c = pl.program_id(0)   # core-split axis ("parallel")
    i = pl.program_id(1)   # this core's block index ("arbitrary")

    @pl.when(i == 0)
    def _():
        acc_ref[...] = jnp.zeros_like(acc_ref)

    x = x_ref[...].astype(jnp.float32)
    # BCE(sigmoid(x), 1) = softplus(-x); BCE(sigmoid(x), 0) = softplus(x).
    # min(., 100) mirrors nn.BCELoss's clamping of the log terms at -100.
    z = -x if is_real else x
    sp = jnp.maximum(z, 0.0) + jnp.log1p(jnp.exp(-jnp.abs(z)))  # stable softplus
    per_elem = jnp.minimum(sp, 100.0)

    if (not mask_tail) and (not has_dup):
        # Fast path: every block is fully in-bounds and unique -> plain VPU add.
        acc_ref[...] += per_elem
    else:
        gstep = c * spc + i          # global block index (unclamped)
        last = total_steps - 1

        @pl.when(gstep < last)
        def _():
            acc_ref[...] += per_elem

        @pl.when(gstep == last)
        def _():
            if mask_tail:
                # Last real block extends past the slab: zero OOB rows.
                r = lax.broadcasted_iota(jnp.int32, (tr, _LANE), 0) + last * tr
                acc_ref[...] += jnp.where(r < rows, per_elem, 0.0)
            else:
                acc_ref[...] += per_elem
        # gstep > last: duplicated (index-clamped) block -> contributes nothing.

    @pl.when(i == spc - 1)
    def _():
        # One cross-sublane reduction per core; lane-dense (1,1,128) store.
        o_ref[...] = jnp.sum(acc_ref[...], axis=0, keepdims=True).reshape(
            1, 1, _LANE)


def gan_loss(pred: jax.Array, is_target_real: bool) -> jax.Array:
    """Pallas equivalent of GANLoss.forward(pred, is_target_real) -> scalar."""
    is_real = bool(is_target_real)
    n = int(pred.size)
    if n == 0:
        raise ValueError("gan_loss: empty prediction tensor")

    flat = jnp.ravel(pred)  # metadata-only for contiguous inputs; native dtype
    rem = n % _LANE
    if rem:
        # Rare ragged tail: pad with neutral logits (per-element loss == 0).
        pad_val = jnp.asarray(1e9 if is_real else -1e9, flat.dtype)
        flat = jnp.concatenate(
            [flat, jnp.full((_LANE - rem,), pad_val, flat.dtype)])
    rows = flat.shape[0] // _LANE
    slab = flat.reshape(rows, _LANE)

    tr = rows if rows <= _TR_MAX else _TR_MAX     # block rows
    total_steps = pl.cdiv(rows, tr)
    ncores = min(_NCORES_MAX, total_steps)
    spc = pl.cdiv(total_steps, ncores)            # steps per core
    mask_tail = (rows % tr) != 0                  # last block partially OOB
    has_dup = (ncores * spc) != total_steps       # clamped duplicate blocks

    if has_dup:
        in_index_map = lambda c, i: (jnp.minimum(c * spc + i, total_steps - 1), 0)
    else:
        in_index_map = lambda c, i: (c * spc + i, 0)

    kernel = functools.partial(
        _ganloss_kernel, is_real=is_real, rows=rows, tr=tr, spc=spc,
        total_steps=total_steps, mask_tail=mask_tail, has_dup=has_dup)

    partials = pl.pallas_call(
        kernel,
        out_shape=jax.ShapeDtypeStruct((ncores, 1, _LANE), jnp.float32),
        grid_spec=pltpu.PrefetchScalarGridSpec(
            num_scalar_prefetch=0,
            grid=(ncores, spc),
            in_specs=[pl.BlockSpec((tr, _LANE), in_index_map)],
            out_specs=pl.BlockSpec((1, 1, _LANE), lambda c, i: (c, 0, 0)),
            scratch_shapes=[pltpu.VMEM((tr, _LANE), jnp.float32)],
        ),
        compiler_params=pltpu.CompilerParams(
            dimension_semantics=("parallel", "arbitrary")),
    )(slab)

    return jnp.sum(partials) / jnp.float32(n)


def _reference_gan_loss(pred, is_target_real):
    # Exact PyTorch semantics: sigmoid -> BCELoss (log terms clamped at -100).
    p = jax.nn.sigmoid(pred.astype(jnp.float32))
    if is_target_real:
        per = -jnp.maximum(jnp.log(p), -100.0)
    else:
        per = -jnp.maximum(jnp.log(1.0 - p), -100.0)
    return jnp.mean(per)


if __name__ == "__main__":
    key = jax.random.PRNGKey(0)
    k1, k2, k3 = jax.random.split(key, 3)

    # Typical discriminator output: NCHW logits (small shape).
    pred = jax.random.normal(k1, (2, 4, 16, 16), dtype=jnp.float32) * 2.0
    # Size not a multiple of 128 -> exercises the neutral-pad path.
    pred_ragged = jax.random.normal(k2, (3, 5, 7), dtype=jnp.float32) * 2.0
    # Larger input -> exercises multi-block grid, 2-core split, tail mask.
    pred_big = jax.random.normal(k3, (328014,), dtype=jnp.float32) * 2.0

    for name, x in (("nchw", pred), ("ragged", pred_ragged), ("big", pred_big)):
        for is_real in (True, False):
            got = jax.block_until_ready(gan_loss(x, is_real))
            want = _reference_gan_loss(x, is_real)
            assert jnp.allclose(got, want, rtol=1e-4, atol=1e-5), (
                name, is_real, got, want)

    print("KERNEL_OK")
</pallas_src>

<mosaic_0001>
module attributes {stable_mosaic.version = 11 : i64} {
  func.func @_ganloss_kernel(%arg0: i32, %arg1: i32, %arg2: memref<16x128xf32, #tpu.memory_space<vmem>>, %arg3: memref<1x1x128xf32, #tpu.memory_space<vmem>>, %arg4: memref<16x128xf32, #tpu.memory_space<vmem>>) attributes {dimension_semantics = [#tpu.dimension_semantics<parallel>, #tpu.dimension_semantics<arbitrary>], iteration_bounds = array<i64: 1, 1>, scalar_prefetch = 0 : i64, scratch_operands = 1 : i64, tpu.core_type = #tpu.core_type<tc>, window_params = [{transform_indices = @transform_0, window_bounds = array<i64: 16, 128>}, {transform_indices = @transform_1, window_bounds = array<i64: 1, 1, 128>}]} {
    %c0_i32 = arith.constant 0 : i32
    %0 = arith.cmpi eq, %arg1, %c0_i32 : i32
    %1 = arith.extui %0 : i1 to i32
    %c0_i32_0 = arith.constant 0 : i32
    %2 = arith.cmpi ne, %1, %c0_i32_0 : i32
    scf.if %2 {
      %cst_11 = arith.constant 0.000000e+00 : f32
      %22 = vector.broadcast %cst_11 : f32 to vector<16x128xf32>
      %c0_12 = arith.constant 0 : index
      %c0_13 = arith.constant 0 : index
      %23 = vector.load %arg4[%c0_12, %c0_13] : memref<16x128xf32, #tpu.memory_space<vmem>>, vector<16x128xf32>
      tpu.vector_store %arg4[%c0_12, %c0_13], %22 {strides = array<i32>} : memref<16x128xf32, #tpu.memory_space<vmem>>, vector<16x128xf32>,
    } else {
    }
    %c0 = arith.constant 0 : index
    %c0_1 = arith.constant 0 : index
    %3 = vector.load %arg2[%c0, %c0_1] : memref<16x128xf32, #tpu.memory_space<vmem>>, vector<16x128xf32>
    %cst = arith.constant 0.000000e+00 : f32
    %4 = vector.broadcast %cst : f32 to vector<16x128xf32>
    %5 = arith.subf %4, %3 : vector<16x128xf32>
    %cst_2 = arith.constant 0.000000e+00 : f32
    %6 = vector.broadcast %cst_2 : f32 to vector<16x128xf32>
    %7 = arith.maximumf %5, %6 : vector<16x128xf32>
    %8 = math.absf %5 : vector<16x128xf32>
    %cst_3 = arith.constant 0.000000e+00 : f32
    %9 = vector.broadcast %cst_3 : f32 to vector<16x128xf32>
    %10 = arith.subf %9, %8 : vector<16x128xf32>
    %11 = math.exp %10 : vector<16x128xf32>
    %12 = math.log1p %11 : vector<16x128xf32>
    %13 = arith.addf %7, %12 : vector<16x128xf32>
    %cst_4 = arith.constant 1.000000e+02 : f32
    %14 = vector.broadcast %cst_4 : f32 to vector<16x128xf32>
    %15 = arith.minimumf %13, %14 : vector<16x128xf32>
    %c0_5 = arith.constant 0 : index
    %c0_6 = arith.constant 0 : index
    %16 = vector.load %arg4[%c0_5, %c0_6] : memref<16x128xf32, #tpu.memory_space<vmem>>, vector<16x128xf32>
    %17 = arith.addf %16, %15 : vector<16x128xf32>
    %c0_7 = arith.constant 0 : index
    %c0_8 = arith.constant 0 : index
    %18 = vector.load %arg4[%c0_7, %c0_8] : memref<16x128xf32, #tpu.memory_space<vmem>>, vector<16x128xf32>
    tpu.vector_store %arg4[%c0_7, %c0_8], %17 {strides = array<i32>} : memref<16x128xf32, #tpu.memory_space<vmem>>, vector<16x128xf32>,
    %c0_i32_9 = arith.constant 0 : i32
    %19 = arith.cmpi eq, %arg1, %c0_i32_9 : i32
    %20 = arith.extui %19 : i1 to i32
    %c0_i32_10 = arith.constant 0 : i32
    %21 = arith.cmpi ne, %20, %c0_i32_10 : i32
    scf.if %21 {
      %c0_11 = arith.constant 0 : index
      %c0_12 = arith.constant 0 : index
      %22 = vector.load %arg4[%c0_11, %c0_12] : memref<16x128xf32, #tpu.memory_space<vmem>>, vector<16x128xf32>
      %cst_13 = arith.constant dense<0.000000e+00> : vector<128xf32>
      %23 = vector.multi_reduction <add>, %22, %cst_13 [0] : vector<16x128xf32> to vector<128xf32>
      %24 = vector.shape_cast %23 : vector<128xf32> to vector<1x128xf32>
      %25 = vector.shape_cast %24 : vector<1x128xf32> to vector<1x1x128xf32>
      %c0_14 = arith.constant 0 : index
      %c0_15 = arith.constant 0 : index
      %c0_16 = arith.constant 0 : index
      %26 = vector.load %arg3[%c0_14, %c0_15, %c0_16] : memref<1x1x128xf32, #tpu.memory_space<vmem>>, vector<1x1x128xf32>
      tpu.vector_store %arg3[%c0_14, %c0_15, %c0_16], %25 {strides = array<i32>} : memref<1x1x128xf32, #tpu.memory_space<vmem>>, vector<1x1x128xf32>,
    } else {
    }
    return
  }
  func.func @transform_0(%arg0: i32, %arg1: i32) -> (i32, i32) {
    %c1_i32 = arith.constant 1 : i32
    %0 = arith.muli %arg0, %c1_i32 : i32
    %1 = arith.addi %0, %arg1 : i32
    %c0_i32 = arith.constant 0 : i32
    %c0_i32_0 = arith.constant 0 : i32
    return %1, %c0_i32 : i32, i32
  }
  func.func @transform_1(%arg0: i32, %arg1: i32) -> (i32, i32, i32) {
    %c0_i32 = arith.constant 0 : i32
    %c0_i32_0 = arith.constant 0 : i32
    %c0_i32_1 = arith.constant 0 : i32
    return %arg0, %c0_i32, %c0_i32_0 : i32, i32, i32
  }
}

</mosaic_0001>

<bundles_post_ra>
// kernel: tpu_custom_call.1
= control target key start
LH: loop header
LB: loop body
LE: loop exit
PB: predicated region body
PF: predicated region fallthrough
CT: control target
= control target key end

     0   :  { %6 = vsyncpa [#allocation4], 0  ;;  %s181_s0 = inlined_call_operand.hbm [shape: f32[16,128], index: 0, kind: input, shape index: {}]   ;;  %s182_s1 = inlined_call_operand.hbm [shape: f32[1,1,128], index: 1, kind: output, shape index: {}]  }
   0x1   :  { %7 = vsyncpa [#allocation5], 0  ;;  %s161_s6 = smov [#allocation3]  }
   0x2   :  { %s17_s7 = sshll.u32 %s161_s6, 4  ;;  %s18_s7 = int_to_ptr.vmem [resolvable:$true] %s17_s7 }
   0x3   :  { %s125_s8 = scalar_lea.vmem %s18_s7, 256  ;;  %p130_p1 = scmp.lt.s32.totalorder %s18_s7, %s18_s7 }
   0x4   :  { %p126_p0 = scmp.ne.s32.totalorder %s18_s7, %s125_s8  ;;  %p131_p2 = scmp.lt.s32.totalorder %s125_s8, %s125_s8 }
   0x6   :  { %p132_p3 = por %p131_p2, %p130_p1 }
   0x8   :  { %p133_p4 = pnand %p132_p3, %p126_p0 }
   0xa   :  { %136 = shalt.err (!%p133_p4)
}
   0xb   :  { %s162_s9 = smov 128   ;;  %s163_s10 = smov 8  }
   0xc   :  { %23 = dma.hbm_to_vmem [thread:$0]  %s181_s0, 256, %s18_s7, [#allocation4], %s162_s9, %s162_s9, %s163_s10  }
   0xd   :  { %157 = dma.done.wait [#allocation4], 256  }
   0xe   :  { %158 = vsyncadd [#allocation4], 4294967040  ;;  %v35_v0 = vld [vmem:[#allocation3] sm:$0xff]  ;;  %v36_v1 = vld [vmem:[#allocation3 + $0x8] sm:$0xff]  ;;  %s164_s0 = smov [#allocation6]  }
   0xf   :  { %v37_v2 = vsub.f32 0.0, %v35_v0  ;;  %v38_v3 = vsub.f32 0.0, %v36_v1  ;;  %s96_s13 = sshll.u32 %s164_s0, 4  ;;  %s97_s13 = int_to_ptr.vmem [resolvable:$true] %s96_s13 }
  0x10   :  { %s137_s14 = scalar_lea.vmem %s97_s13, 16  ;;  %s141_s15 = scalar_lea.vmem %s97_s13, 32 }
  0x11   :  { %v41_v4 = vand.u32 2147483647, %v37_v2  ;;  %v42_v5 = vand.u32 2147483647, %v38_v3  ;;  %v39_v22 = vmax.f32 %v37_v2, 0.0  ;;  %v40_v25 = vmax.f32 %v38_v3, 0.0  ;;  %p138_p5 = scmp.ne.s32.totalorder %s97_s13, %s137_s14  ;;  %p142_p6 = scmp.lt.s32.totalorder %s97_s13, %s97_s13 }
  0x12   :  { %p143_p7 = scmp.lt.s32.totalorder %s141_s15, %s137_s14 }
  0x13   :  { %v43_v6 = vsub.f32 0.0, %v41_v4  ;;  %v44_v7 = vsub.f32 0.0, %v42_v5 }
  0x14   :  { %p144_p8 = por %p143_p7, %p142_p6 }
  0x15   :  { %v45_v8 = vmul.f32 1.442695, %v43_v6  ;;  %v47_v9 = vmul.f32 1.442695, %v44_v7 }
  0x16   :  { %p145_p9 = pnand %p144_p8, %p138_p5 }
  0x17   :  { %109 = vpow2.f32 %v45_v8 }
  0x18   :  { %111 = vpow2.f32 %v47_v9 }
  0x24   :  { %v110_v10 = vpop.eup %109 }
  0x25   :  { %v112_v11 = vpop.eup %111  ;;  %v49_v12 = vadd.f32 1.0, %v110_v10  ;;  %v52_v14 = vmul.f32 -0.5, %v110_v10  ;;  %v55_v17 = vand.u32 2147483647, %v110_v10 }
  0x26   :  { %v58_v13 = vadd.f32 1.0, %v112_v11  ;;  %v61_v15 = vmul.f32 -0.5, %v112_v11  ;;  %v64_v19 = vand.u32 2147483647, %v112_v11 }
  0x27   :  { %113 = vlog2.f32 %v49_v12  ;;  %v53_v16 = vadd.f32 1.0, %v52_v14  ;;  %vm56_vm0 = vcmp.lt.f32.partialorder %v55_v17, 0.0004427343 }
  0x28   :  { %115 = vlog2.f32 %v58_v13  ;;  %v62_v18 = vadd.f32 1.0, %v61_v15  ;;  %vm65_vm1 = vcmp.lt.f32.partialorder %v64_v19, 0.0004427343 }
  0x29   :  { %v54_v20 = vmul.f32 %v110_v10, %v53_v16 }
  0x2a   :  { %v63_v23 = vmul.f32 %v112_v11, %v62_v18 }
  0x34   :  { %v114_v21 = vpop.eup %113 }
  0x35   :  { %v116_v24 = vpop.eup %115  ;;  %v51_v26 = vmul.f32 0.6931472, %v114_v21 }
  0x36   :  { %v60_v27 = vmul.f32 0.6931472, %v116_v24 }
  0x37   :  { %v57_v28 = vsel %vm56_vm0, %v54_v20, %v51_v26 }
  0x38   :  { %v66_v29 = vsel %vm65_vm1, %v63_v23, %v60_v27  ;;  %v67_v30 = vadd.f32 %v57_v28, %v39_v22 }
  0x39   :  { %v68_v31 = vadd.f32 %v66_v29, %v40_v25 }
  0x3a   :  { %v69_v32 = vmin.f32 %v67_v30, 100.0 }
  0x3b   :  { %v70_v33 = vmin.f32 %v68_v31, 100.0 }
  0x3d   :  { %v82_v34 = vadd.f32 %v70_v33, %v69_v32 }
  0x3f   :  { %v83_v35 = vrot.slane %v82_v34, 4 }
  0x41   :  { %v84_v36 = vadd.f32 %v83_v35, %v82_v34 }
  0x43   :  { %v85_v37 = vrot.slane %v84_v36, 2 }
  0x45   :  { %v86_v38 = vadd.f32 %v85_v37, %v84_v36 }
  0x47   :  { %v87_v39 = vrot.slane %v86_v38, 1 }
  0x49   :  { %v88_v40 = vadd.f32 %v87_v39, %v86_v38 }
  0x4b   :  { %89 = vst [vmem:[#allocation6] sm:$0x1] %v88_v40 }
  0x4c   :  { %148 = shalt.err (!%p145_p9)
}
  0x4d   :  { %99 = dma.vmem_to_hbm [thread:$0]  %s97_s13, 16, %s182_s1, [#allocation5]  }
  0x4e   :  { %159 = dma.done.wait [#allocation5], 16  }
  0x4f   :  { %160 = vsyncadd [#allocation5], 4294967280 }
  0x50   :  { %103 = vsyncpa [#allocation4], 1 }
  0x51   :  { %104 = vsyncpa [#allocation5], 1 }

</bundles_post_ra>
